<compile_context>
chip_gen: v6e
topology: v6e:2x2x1
jax: 0.10.0
libtpu: 0.0.40
codegen_flags: <defaults>
</compile_context>

<pallas_src>
import functools

import jax
import jax.numpy as jnp
from jax import lax
from jax.experimental import pallas as pl
from jax.experimental.pallas import tpu as pltpu


# ----------------------------- in-kernel math helpers -----------------------------

def _erf_approx(x):
    # Abramowitz & Stegun 7.1.26 rational approximation (~1.5e-7 abs err for the poly);
    # the divide is replaced with an EUP approx reciprocal (divide-free on the VPU).
    a1, a2, a3, a4, a5 = 0.254829592, -0.284496736, 1.421413741, -1.453152027, 1.061405429
    p = 0.3275911
    sgn = jnp.where(x >= 0.0, 1.0, -1.0)
    ax = jnp.abs(x)
    t = pl.reciprocal(1.0 + p * ax, approx=True)
    poly = ((((a5 * t + a4) * t + a3) * t + a2) * t + a1) * t
    y = 1.0 - poly * jnp.exp(-ax * ax)
    return sgn * y


def _gelu_exact(x):
    # PyTorch nn.GELU() default: 0.5 * x * (1 + erf(x / sqrt(2)))
    return 0.5 * x * (1.0 + _erf_approx(x * 0.7071067811865476))


def _layernorm_no_affine(x, eps=1e-5):
    # nn.LayerNorm(head_dim, elementwise_affine=False): biased variance, eps=1e-5.
    mu = jnp.mean(x, axis=-1, keepdims=True)
    xc = x - mu
    var = jnp.mean(xc * xc, axis=-1, keepdims=True)
    return xc * lax.rsqrt(var + eps)


# ----------------------------------- kernel ---------------------------------------

def paf_kernel(x_ref, wqkv_ref, wout_ref, bout_ref, w1_ref, b1_ref, w2_ref, b2_ref,
               o_ref, q_scr, k_scr, v_scr, acc_ref, *, heads, scale, tq):
    n, dim = x_ref.shape
    n_q_tiles = n // tq
    n_mlp_chunks = w1_ref.shape[0]
    cdt = x_ref.dtype                       # compute dtype for MXU operands (bf16 or f32)

    x = x_ref[...]                          # (n, dim), compute dtype

    # Shared f32 accumulator for both branches (attention out-proj + MLP partials).
    acc_ref[...] = jnp.zeros_like(acc_ref)

    # ---------------- parallel MLP branch, chunked over mlp_dim ----------------
    # Avoids materializing the full (n, mlp_dim) hidden activation; VMEM is O(n * chunk).
    def mlp_body(c, carry):
        h1 = jnp.dot(x, w1_ref[c], preferred_element_type=jnp.float32) + b1_ref[c]  # (n, mc) f32
        h1 = _gelu_exact(h1).astype(cdt)
        acc_ref[...] += jnp.dot(h1, w2_ref[c], preferred_element_type=jnp.float32)  # (n, dim)
        return carry

    lax.fori_loop(0, n_mlp_chunks, mlp_body, 0)

    # ---------------- attention branch: per-head, q-tiled ----------------
    # TODO(synk): for very long sequences add kv-tiling (online softmax) and a second
    # parallel grid axis (q-tiles / heads) so both v7x TensorCores stay busy at small batch.
    def head_body(h, carry):
        wq = wqkv_ref[0, h]                                   # (dim, d)
        wk = wqkv_ref[1, h]
        wv = wqkv_ref[2, h]
        wo_h = wout_ref[h]                                    # (d, dim)

        # per-head projections; LN in f32; softmax scale folded into q (n*d muls, not n*n).
        q_scr[...] = (_layernorm_no_affine(
            jnp.dot(x, wq, preferred_element_type=jnp.float32)) * scale).astype(cdt)
        k_scr[...] = _layernorm_no_affine(
            jnp.dot(x, wk, preferred_element_type=jnp.float32)).astype(cdt)
        v_scr[...] = jnp.dot(x, wv, preferred_element_type=jnp.float32).astype(cdt)

        kh = k_scr[...]                                       # (n, d), loop-invariant
        vh = v_scr[...]                                       # (n, d)

        def q_body(t, carry2):
            qs = pl.multiple_of(t * tq, tq)
            qt = q_scr[pl.ds(qs, tq), :]                      # (tq, d)
            # contract last dims of both operands -> no explicit transpose of k.
            s = lax.dot_general(qt, kh, (((1,), (1,)), ((), ())),
                                preferred_element_type=jnp.float32)        # (tq, n) f32
            s = s - jnp.max(s, axis=-1, keepdims=True)
            e = jnp.exp(s)
            p = (e * pl.reciprocal(jnp.sum(e, axis=-1, keepdims=True),
                                   approx=True)).astype(cdt)               # (tq, n)
            ot = jnp.dot(p, vh, preferred_element_type=jnp.float32).astype(cdt)  # (tq, d)
            # fuse the per-head slice of the output projection; accumulate lane-dense rows.
            acc_ref[pl.ds(qs, tq), :] += jnp.dot(ot, wo_h,
                                                 preferred_element_type=jnp.float32)
            return carry2

        lax.fori_loop(0, n_q_tiles, q_body, 0)
        return carry

    lax.fori_loop(0, heads, head_body, 0)

    # biases of to_out and the second MLP linear are plain (1, dim) adds on the sum.
    o_ref[...] = (acc_ref[...] + bout_ref[...] + b2_ref[...]).astype(o_ref.dtype)


# ---------------------------------- wrapper ----------------------------------------

def _pick_tile(total, target):
    """Largest divisor of `total` that is <= target (== total if total <= target)."""
    if total <= target:
        return total
    best = 1
    for c in range(1, target + 1):
        if total % c == 0:
            best = c
    return best


def parallel_attention_feed(x, params, *, heads, compute_dtype=jnp.bfloat16):
    b, n, dim = x.shape
    assert dim % heads == 0
    d = dim // heads
    mlp_dim = params["w1"].shape[1]
    scale = float(dim) ** (-0.5)       # module uses full dim, not head_dim (matches spec)

    tq = _pick_tile(n, 256)            # q-tile rows
    mc = _pick_tile(mlp_dim, 1024)     # mlp_dim chunk width
    n_mlp_chunks = mlp_dim // mc

    cdt = jnp.dtype(compute_dtype)
    f32 = jnp.float32

    # Layout transforms so every dynamic index inside the kernel is on a leading dim.
    wqkv_r = params["wqkv"].reshape(dim, 3, heads, d).transpose(1, 2, 0, 3).astype(cdt)
    wout_r = params["wout"].reshape(heads, d, dim).astype(cdt)
    w1_r = params["w1"].reshape(dim, n_mlp_chunks, mc).transpose(1, 0, 2).astype(cdt)
    b1_r = params["b1"].reshape(n_mlp_chunks, 1, mc).astype(f32)
    w2_r = params["w2"].reshape(n_mlp_chunks, mc, dim).astype(cdt)
    bout = params["bout"].astype(f32)
    b2 = params["b2"].astype(f32)
    x_c = x.astype(cdt)

    # VMEM budget: weights (double-buffered by BlockSpec), x/out blocks, scratch, temps.
    # TODO(synk): weights are grid-invariant; single-buffering them (pl.Buffered(1) or
    # pl.ANY + one manual make_async_copy) would halve weight VMEM — matters on v7x (64 MiB).
    def _nbytes(a):
        return int(a.size) * a.dtype.itemsize
    weight_bytes = sum(_nbytes(a) for a in (wqkv_r, wout_r, w1_r, b1_r, w2_r, bout, b2))
    io_bytes = 2 * n * dim * (cdt.itemsize + jnp.dtype(x.dtype).itemsize)
    scratch_bytes = 3 * n * d * cdt.itemsize + n * dim * 4
    tmp_bytes = n * mc * 4 + tq * n * 4 + 2 * n * dim * 4
    est = 2 * weight_bytes + io_bytes + scratch_bytes + tmp_bytes
    vmem_limit = int(min(max(2 * est + (2 << 20), 16 << 20), 64 << 20))

    kernel = functools.partial(paf_kernel, heads=heads, scale=scale, tq=tq)

    return pl.pallas_call(
        kernel,
        out_shape=jax.ShapeDtypeStruct((b, n, dim), x.dtype),
        grid=(b,),
        in_specs=[
            pl.BlockSpec((None, n, dim), lambda i: (i, 0, 0)),           # x   (batch squeezed)
            pl.BlockSpec((3, heads, dim, d), lambda i: (0, 0, 0, 0)),    # W_qkv per-head slabs
            pl.BlockSpec((heads, d, dim), lambda i: (0, 0, 0)),          # W_out per-head slabs
            pl.BlockSpec((1, dim), lambda i: (0, 0)),                    # b_out
            pl.BlockSpec((n_mlp_chunks, dim, mc), lambda i: (0, 0, 0)),  # W1 chunks
            pl.BlockSpec((n_mlp_chunks, 1, mc), lambda i: (0, 0, 0)),    # b1 chunks
            pl.BlockSpec((n_mlp_chunks, mc, dim), lambda i: (0, 0, 0)),  # W2 chunks
            pl.BlockSpec((1, dim), lambda i: (0, 0)),                    # b2
        ],
        out_specs=pl.BlockSpec((None, n, dim), lambda i: (i, 0, 0)),
        scratch_shapes=[
            pltpu.VMEM((n, d), cdt),       # q (LN'd, pre-scaled)
            pltpu.VMEM((n, d), cdt),       # k (LN'd)
            pltpu.VMEM((n, d), cdt),       # v
            pltpu.VMEM((n, dim), f32),     # shared accumulator (attn out-proj + MLP)
        ],
        compiler_params=pltpu.CompilerParams(
            dimension_semantics=("parallel",),
            vmem_limit_bytes=vmem_limit,
        ),
    )(x_c, wqkv_r, wout_r, bout, w1_r, b1_r, w2_r, b2)


# ------------------------------ pure-JAX reference ---------------------------------

def reference(x, params, *, heads):
    b, n, dim = x.shape
    d = dim // heads
    scale = float(dim) ** (-0.5)

    def ln(t):
        mu = t.mean(-1, keepdims=True)
        var = ((t - mu) ** 2).mean(-1, keepdims=True)
        return (t - mu) / jnp.sqrt(var + 1e-5)

    qkv = x @ params["wqkv"]                                   # (b, n, 3*dim)
    qkv = qkv.reshape(b, n, 3, heads, d)
    qkv = jnp.transpose(qkv, (2, 0, 3, 1, 4))                  # (3, b, h, n, d)
    q, k, v = qkv[0], qkv[1], qkv[2]
    q, k = ln(q), ln(k)
    dots = jnp.einsum("bhid,bhjd->bhij", q, k) * scale
    attn = jax.nn.softmax(dots, axis=-1)
    av = jnp.einsum("bhij,bhjd->bhid", attn, v)                # (b, h, n, d)
    av = jnp.transpose(av, (0, 2, 1, 3)).reshape(b, n, dim)    # 'b h n d -> b n (h d)'
    attn_out = av @ params["wout"] + params["bout"][0]
    h1 = jax.nn.gelu(x @ params["w1"] + params["b1"][0], approximate=False)
    par = h1 @ params["w2"] + params["b2"][0]
    return attn_out + par


# ------------------------------------ main ------------------------------------------

if __name__ == "__main__":
    batch, seq, dim, heads, mlp_dim = 2, 8, 32, 2, 64
    assert dim % heads == 0

    key = jax.random.PRNGKey(0)
    ks = jax.random.split(key, 8)

    params = {
        "wqkv": jax.random.normal(ks[0], (dim, 3 * dim), jnp.float32) / jnp.sqrt(dim),
        "wout": jax.random.normal(ks[1], (dim, dim), jnp.float32) / jnp.sqrt(dim),
        "bout": jax.random.normal(ks[2], (1, dim), jnp.float32) * 0.02,
        "w1":   jax.random.normal(ks[3], (dim, mlp_dim), jnp.float32) / jnp.sqrt(dim),
        "b1":   jax.random.normal(ks[4], (1, mlp_dim), jnp.float32) * 0.02,
        "w2":   jax.random.normal(ks[5], (mlp_dim, dim), jnp.float32) / jnp.sqrt(mlp_dim),
        "b2":   jax.random.normal(ks[6], (1, dim), jnp.float32) * 0.02,
    }
    x = jax.random.normal(ks[7], (batch, seq, dim), jnp.float32)

    ref = jax.block_until_ready(reference(x, params, heads=heads))

    # f32 matmul path: tight check of the kernel logic (approx reciprocals only source of err).
    out_f32 = jax.block_until_ready(
        parallel_attention_feed(x, params, heads=heads, compute_dtype=jnp.float32))
    assert out_f32.shape == (batch, seq, dim)
    assert bool(jnp.allclose(out_f32, ref, atol=5e-3, rtol=5e-3)), "f32 mismatch vs reference"

    # bf16 matmul path (recommended perf config): f32 accumulation, looser tolerance.
    out_bf16 = jax.block_until_ready(
        parallel_attention_feed(x, params, heads=heads, compute_dtype=jnp.bfloat16))
    assert out_bf16.shape == (batch, seq, dim)
    assert bool(jnp.allclose(out_bf16, ref, atol=3e-2, rtol=3e-2)), "bf16 mismatch vs reference"

    print("KERNEL_OK")
</pallas_src>

<mosaic_0001>
module attributes {stable_mosaic.version = 11 : i64} {
  func.func @paf_kernel(%arg0: i32, %arg1: memref<1x8x32xf32, #tpu.memory_space<vmem>>, %arg2: memref<3x2x32x16xf32, #tpu.memory_space<vmem>>, %arg3: memref<2x16x32xf32, #tpu.memory_space<vmem>>, %arg4: memref<1x32xf32, #tpu.memory_space<vmem>>, %arg5: memref<1x32x64xf32, #tpu.memory_space<vmem>>, %arg6: memref<1x1x64xf32, #tpu.memory_space<vmem>>, %arg7: memref<1x64x32xf32, #tpu.memory_space<vmem>>, %arg8: memref<1x32xf32, #tpu.memory_space<vmem>>, %arg9: memref<1x8x32xf32, #tpu.memory_space<vmem>>, %arg10: memref<8x16xf32, #tpu.memory_space<vmem>>, %arg11: memref<8x16xf32, #tpu.memory_space<vmem>>, %arg12: memref<8x16xf32, #tpu.memory_space<vmem>>, %arg13: memref<8x32xf32, #tpu.memory_space<vmem>>) attributes {dimension_semantics = [#tpu.dimension_semantics<parallel>], iteration_bounds = array<i64: 2>, scalar_prefetch = 0 : i64, scratch_operands = 4 : i64, tpu.core_type = #tpu.core_type<tc>, window_params = [{transform_indices = @transform_0, window_bounds = array<i64: 1, 8, 32>}, {pipeline_mode = #tpu.pipeline_mode<synchronous>, transform_indices = @transform_1, window_bounds = array<i64: 3, 2, 32, 16>}, {pipeline_mode = #tpu.pipeline_mode<synchronous>, transform_indices = @transform_2, window_bounds = array<i64: 2, 16, 32>}, {pipeline_mode = #tpu.pipeline_mode<synchronous>, transform_indices = @transform_3, window_bounds = array<i64: 1, 32>}, {pipeline_mode = #tpu.pipeline_mode<synchronous>, transform_indices = @transform_4, window_bounds = array<i64: 1, 32, 64>}, {pipeline_mode = #tpu.pipeline_mode<synchronous>, transform_indices = @transform_5, window_bounds = array<i64: 1, 1, 64>}, {pipeline_mode = #tpu.pipeline_mode<synchronous>, transform_indices = @transform_6, window_bounds = array<i64: 1, 64, 32>}, {pipeline_mode = #tpu.pipeline_mode<synchronous>, transform_indices = @transform_7, window_bounds = array<i64: 1, 32>}, {transform_indices = @transform_8, window_bounds = array<i64: 1, 8, 32>}]} {
    %c0 = arith.constant 0 : index
    %c0_0 = arith.constant 0 : index
    %c0_1 = arith.constant 0 : index
    %0 = vector.load %arg1[%c0, %c0_0, %c0_1] : memref<1x8x32xf32, #tpu.memory_space<vmem>>, vector<1x8x32xf32>
    %1 = vector.shape_cast %0 : vector<1x8x32xf32> to vector<8x32xf32>
    %cst = arith.constant 0.000000e+00 : f32
    %2 = vector.broadcast %cst : f32 to vector<8x32xf32>
    %c0_2 = arith.constant 0 : index
    %c0_3 = arith.constant 0 : index
    %3 = vector.load %arg13[%c0_2, %c0_3] : memref<8x32xf32, #tpu.memory_space<vmem>>, vector<8x32xf32>
    tpu.vector_store %arg13[%c0_2, %c0_3], %2 {strides = array<i32>} : memref<8x32xf32, #tpu.memory_space<vmem>>, vector<8x32xf32>,
    %c0_i32 = arith.constant 0 : i32
    %4 = arith.index_cast %c0_i32 : i32 to index
    %c0_4 = arith.constant 0 : index
    %c0_5 = arith.constant 0 : index
    %5 = vector.load %arg5[%4, %c0_4, %c0_5] : memref<1x32x64xf32, #tpu.memory_space<vmem>>, vector<1x32x64xf32>
    %6 = vector.shape_cast %5 : vector<1x32x64xf32> to vector<32x64xf32>
    %cst_6 = arith.constant dense<0.000000e+00> : vector<8x64xf32>
    %7 = tpu.matmul %1, %6, %cst_6 {dimension_numbers = #tpu.dot_dimension_numbers<[1], [0], [0], [1], [0, 0, 1, 1], [], []>} : vector<8x32xf32>, vector<32x64xf32>, vector<8x64xf32> -> vector<8x64xf32>
    %8 = arith.index_cast %c0_i32 : i32 to index
    %c0_7 = arith.constant 0 : index
    %c0_8 = arith.constant 0 : index
    %9 = vector.load %arg6[%8, %c0_7, %c0_8] : memref<1x1x64xf32, #tpu.memory_space<vmem>>, vector<1x1x64xf32>
    %10 = vector.shape_cast %9 : vector<1x1x64xf32> to vector<1x64xf32>
    %11 = vector.broadcast %10 : vector<1x64xf32> to vector<8x64xf32>
    %12 = arith.addf %7, %11 : vector<8x64xf32>
    %cst_9 = arith.constant 5.000000e-01 : f32
    %13 = vector.broadcast %cst_9 : f32 to vector<8x64xf32>
    %14 = arith.mulf %13, %12 : vector<8x64xf32>
    %cst_10 = arith.constant 0.707106769 : f32
    %15 = vector.broadcast %cst_10 : f32 to vector<8x64xf32>
    %16 = arith.mulf %12, %15 : vector<8x64xf32>
    %cst_11 = arith.constant 0.000000e+00 : f32
    %17 = vector.broadcast %cst_11 : f32 to vector<8x64xf32>
    %18 = arith.cmpf oge, %16, %17 : vector<8x64xf32>
    %cst_12 = arith.constant 1.000000e+00 : f32
    %cst_13 = arith.constant -1.000000e+00 : f32
    %19 = vector.broadcast %cst_12 : f32 to vector<8x64xf32>
    %20 = vector.broadcast %cst_13 : f32 to vector<8x64xf32>
    %21 = arith.select %18, %19, %20 : vector<8x64xi1>, vector<8x64xf32>
    %22 = math.absf %16 : vector<8x64xf32>
    %cst_14 = arith.constant 0.327591091 : f32
    %23 = vector.broadcast %cst_14 : f32 to vector<8x64xf32>
    %24 = arith.mulf %23, %22 : vector<8x64xf32>
    %cst_15 = arith.constant 1.000000e+00 : f32
    %25 = vector.broadcast %cst_15 : f32 to vector<8x64xf32>
    %26 = arith.addf %25, %24 : vector<8x64xf32>
    %27 = tpu.reciprocal %26 {approx = true} : vector<8x64xf32> -> vector<8x64xf32>
    %cst_16 = arith.constant 1.06140542 : f32
    %28 = vector.broadcast %cst_16 : f32 to vector<8x64xf32>
    %29 = arith.mulf %28, %27 : vector<8x64xf32>
    %cst_17 = arith.constant -1.45315206 : f32
    %30 = vector.broadcast %cst_17 : f32 to vector<8x64xf32>
    %31 = arith.addf %29, %30 : vector<8x64xf32>
    %32 = arith.mulf %31, %27 : vector<8x64xf32>
    %cst_18 = arith.constant 1.42141378 : f32
    %33 = vector.broadcast %cst_18 : f32 to vector<8x64xf32>
    %34 = arith.addf %32, %33 : vector<8x64xf32>
    %35 = arith.mulf %34, %27 : vector<8x64xf32>
    %cst_19 = arith.constant -0.284496725 : f32
    %36 = vector.broadcast %cst_19 : f32 to vector<8x64xf32>
    %37 = arith.addf %35, %36 : vector<8x64xf32>
    %38 = arith.mulf %37, %27 : vector<8x64xf32>
    %cst_20 = arith.constant 0.254829586 : f32
    %39 = vector.broadcast %cst_20 : f32 to vector<8x64xf32>
    %40 = arith.addf %38, %39 : vector<8x64xf32>
    %41 = arith.mulf %40, %27 : vector<8x64xf32>
    %cst_21 = arith.constant 0.000000e+00 : f32
    %42 = vector.broadcast %cst_21 : f32 to vector<8x64xf32>
    %43 = arith.subf %42, %22 : vector<8x64xf32>
    %44 = arith.mulf %43, %22 : vector<8x64xf32>
    %45 = math.exp %44 : vector<8x64xf32>
    %46 = arith.mulf %41, %45 : vector<8x64xf32>
    %cst_22 = arith.constant 1.000000e+00 : f32
    %47 = vector.broadcast %cst_22 : f32 to vector<8x64xf32>
    %48 = arith.subf %47, %46 : vector<8x64xf32>
    %49 = arith.mulf %21, %48 : vector<8x64xf32>
    %cst_23 = arith.constant 1.000000e+00 : f32
    %50 = vector.broadcast %cst_23 : f32 to vector<8x64xf32>
    %51 = arith.addf %50, %49 : vector<8x64xf32>
    %52 = arith.mulf %14, %51 : vector<8x64xf32>
    %c0_24 = arith.constant 0 : index
    %c0_25 = arith.constant 0 : index
    %53 = vector.load %arg13[%c0_24, %c0_25] : memref<8x32xf32, #tpu.memory_space<vmem>>, vector<8x32xf32>
    %54 = arith.index_cast %c0_i32 : i32 to index
    %c0_26 = arith.constant 0 : index
    %c0_27 = arith.constant 0 : index
    %55 = vector.load %arg7[%54, %c0_26, %c0_27] : memref<1x64x32xf32, #tpu.memory_space<vmem>>, vector<1x64x32xf32>
    %56 = vector.shape_cast %55 : vector<1x64x32xf32> to vector<64x32xf32>
    %cst_28 = arith.constant dense<0.000000e+00> : vector<8x32xf32>
    %57 = tpu.matmul %52, %56, %cst_28 {dimension_numbers = #tpu.dot_dimension_numbers<[1], [0], [0], [1], [0, 0, 1, 1], [], []>} : vector<8x64xf32>, vector<64x32xf32>, vector<8x32xf32> -> vector<8x32xf32>
    %58 = arith.addf %53, %57 : vector<8x32xf32>
    %c0_29 = arith.constant 0 : index
    %c0_30 = arith.constant 0 : index
    %59 = vector.load %arg13[%c0_29, %c0_30] : memref<8x32xf32, #tpu.memory_space<vmem>>, vector<8x32xf32>
    tpu.vector_store %arg13[%c0_29, %c0_30], %58 {strides = array<i32>} : memref<8x32xf32, #tpu.memory_space<vmem>>, vector<8x32xf32>,
    %c1_i32 = arith.constant 1 : i32
    %c0_i32_31 = arith.constant 0 : i32
    %c2_i32 = arith.constant 2 : i32
    %60 = arith.addi %c0_i32_31, %c2_i32 : i32
    %c1_i32_32 = arith.constant 1 : i32
    scf.for %arg14 = %c0_i32_31 to %60 step %c1_i32_32  : i32 {
      %c0_43 = arith.constant 0 : index
      %71 = arith.index_cast %arg14 : i32 to index
      %c0_44 = arith.constant 0 : index
      %c0_45 = arith.constant 0 : index
      %72 = vector.load %arg2[%c0_43, %71, %c0_44, %c0_45] : memref<3x2x32x16xf32, #tpu.memory_space<vmem>>, vector<1x1x32x16xf32>
      %73 = vector.shape_cast %72 : vector<1x1x32x16xf32> to vector<32x16xf32>
      %c1 = arith.constant 1 : index
      %74 = arith.index_cast %arg14 : i32 to index
      %c0_46 = arith.constant 0 : index
      %c0_47 = arith.constant 0 : index
      %75 = vector.load %arg2[%c1, %74, %c0_46, %c0_47] : memref<3x2x32x16xf32, #tpu.memory_space<vmem>>, vector<1x1x32x16xf32>
      %76 = vector.shape_cast %75 : vector<1x1x32x16xf32> to vector<32x16xf32>
      %c2 = arith.constant 2 : index
      %77 = arith.index_cast %arg14 : i32 to index
      %c0_48 = arith.constant 0 : index
      %c0_49 = arith.constant 0 : index
      %78 = vector.load %arg2[%c2, %77, %c0_48, %c0_49] : memref<3x2x32x16xf32, #tpu.memory_space<vmem>>, vector<1x1x32x16xf32>
      %79 = vector.shape_cast %78 : vector<1x1x32x16xf32> to vector<32x16xf32>
      %80 = arith.index_cast %arg14 : i32 to index
      %c0_50 = arith.constant 0 : index
      %c0_51 = arith.constant 0 : index
      %81 = vector.load %arg3[%80, %c0_50, %c0_51] : memref<2x16x32xf32, #tpu.memory_space<vmem>>, vector<1x16x32xf32>
      %82 = vector.shape_cast %81 : vector<1x16x32xf32> to vector<16x32xf32>
      %cst_52 = arith.constant dense<0.000000e+00> : vector<8x16xf32>
      %83 = tpu.matmul %1, %73, %cst_52 {dimension_numbers = #tpu.dot_dimension_numbers<[1], [0], [0], [1], [0, 0, 1, 1], [], []>} : vector<8x32xf32>, vector<32x16xf32>, vector<8x16xf32> -> vector<8x16xf32>
      %cst_53 = arith.constant dense<0.000000e+00> : vector<8xf32>
      %84 = vector.multi_reduction <add>, %83, %cst_53 [1] : vector<8x16xf32> to vector<8xf32>
      %85 = vector.shape_cast %84 : vector<8xf32> to vector<8x1xf32>
      %cst_54 = arith.constant 1.600000e+01 : f32
      %86 = vector.broadcast %cst_54 : f32 to vector<8x1xf32>
      %87 = arith.divf %85, %86 : vector<8x1xf32>
      %88 = vector.broadcast %87 : vector<8x1xf32> to vector<8x16xf32>
      %89 = arith.subf %83, %88 : vector<8x16xf32>
      %90 = arith.mulf %89, %89 : vector<8x16xf32>
      %cst_55 = arith.constant dense<0.000000e+00> : vector<8xf32>
      %91 = vector.multi_reduction <add>, %90, %cst_55 [1] : vector<8x16xf32> to vector<8xf32>
      %92 = vector.shape_cast %91 : vector<8xf32> to vector<8x1xf32>
      %cst_56 = arith.constant 1.600000e+01 : f32
      %93 = vector.broadcast %cst_56 : f32 to vector<8x1xf32>
      %94 = arith.divf %92, %93 : vector<8x1xf32>
      %cst_57 = arith.constant 9.99999974E-6 : f32
      %95 = vector.broadcast %cst_57 : f32 to vector<8x1xf32>
      %96 = arith.addf %94, %95 : vector<8x1xf32>
      %97 = math.rsqrt %96 : vector<8x1xf32>
      %98 = vector.broadcast %97 : vector<8x1xf32> to vector<8x16xf32>
      %99 = arith.mulf %89, %98 : vector<8x16xf32>
      %cst_58 = arith.constant 0.176776692 : f32
      %100 = vector.broadcast %cst_58 : f32 to vector<8x16xf32>
      %101 = arith.mulf %99, %100 : vector<8x16xf32>
      %c0_59 = arith.constant 0 : index
      %c0_60 = arith.constant 0 : index
      %102 = vector.load %arg10[%c0_59, %c0_60] : memref<8x16xf32, #tpu.memory_space<vmem>>, vector<8x16xf32>
      tpu.vector_store %arg10[%c0_59, %c0_60], %101 {strides = array<i32>} : memref<8x16xf32, #tpu.memory_space<vmem>>, vector<8x16xf32>,
      %cst_61 = arith.constant dense<0.000000e+00> : vector<8x16xf32>
      %103 = tpu.matmul %1, %76, %cst_61 {dimension_numbers = #tpu.dot_dimension_numbers<[1], [0], [0], [1], [0, 0, 1, 1], [], []>} : vector<8x32xf32>, vector<32x16xf32>, vector<8x16xf32> -> vector<8x16xf32>
      %cst_62 = arith.constant dense<0.000000e+00> : vector<8xf32>
      %104 = vector.multi_reduction <add>, %103, %cst_62 [1] : vector<8x16xf32> to vector<8xf32>
      %105 = vector.shape_cast %104 : vector<8xf32> to vector<8x1xf32>
      %cst_63 = arith.constant 1.600000e+01 : f32
      %106 = vector.broadcast %cst_63 : f32 to vector<8x1xf32>
      %107 = arith.divf %105, %106 : vector<8x1xf32>
      %108 = vector.broadcast %107 : vector<8x1xf32> to vector<8x16xf32>
      %109 = arith.subf %103, %108 : vector<8x16xf32>
      %110 = arith.mulf %109, %109 : vector<8x16xf32>
      %cst_64 = arith.constant dense<0.000000e+00> : vector<8xf32>
      %111 = vector.multi_reduction <add>, %110, %cst_64 [1] : vector<8x16xf32> to vector<8xf32>
      %112 = vector.shape_cast %111 : vector<8xf32> to vector<8x1xf32>
      %cst_65 = arith.constant 1.600000e+01 : f32
      %113 = vector.broadcast %cst_65 : f32 to vector<8x1xf32>
      %114 = arith.divf %112, %113 : vector<8x1xf32>
      %cst_66 = arith.constant 9.99999974E-6 : f32
      %115 = vector.broadcast %cst_66 : f32 to vector<8x1xf32>
      %116 = arith.addf %114, %115 : vector<8x1xf32>
      %117 = math.rsqrt %116 : vector<8x1xf32>
      %118 = vector.broadcast %117 : vector<8x1xf32> to vector<8x16xf32>
      %119 = arith.mulf %109, %118 : vector<8x16xf32>
      %c0_67 = arith.constant 0 : index
      %c0_68 = arith.constant 0 : index
      %120 = vector.load %arg11[%c0_67, %c0_68] : memref<8x16xf32, #tpu.memory_space<vmem>>, vector<8x16xf32>
      tpu.vector_store %arg11[%c0_67, %c0_68], %119 {strides = array<i32>} : memref<8x16xf32, #tpu.memory_space<vmem>>, vector<8x16xf32>,
      %cst_69 = arith.constant dense<0.000000e+00> : vector<8x16xf32>
      %121 = tpu.matmul %1, %79, %cst_69 {dimension_numbers = #tpu.dot_dimension_numbers<[1], [0], [0], [1], [0, 0, 1, 1], [], []>} : vector<8x32xf32>, vector<32x16xf32>, vector<8x16xf32> -> vector<8x16xf32>
      %c0_70 = arith.constant 0 : index
      %c0_71 = arith.constant 0 : index
      %122 = vector.load %arg12[%c0_70, %c0_71] : memref<8x16xf32, #tpu.memory_space<vmem>>, vector<8x16xf32>
      tpu.vector_store %arg12[%c0_70, %c0_71], %121 {strides = array<i32>} : memref<8x16xf32, #tpu.memory_space<vmem>>, vector<8x16xf32>,
      %c0_72 = arith.constant 0 : index
      %c0_73 = arith.constant 0 : index
      %123 = vector.load %arg11[%c0_72, %c0_73] : memref<8x16xf32, #tpu.memory_space<vmem>>, vector<8x16xf32>
      %c0_74 = arith.constant 0 : index
      %c0_75 = arith.constant 0 : index
      %124 = vector.load %arg12[%c0_74, %c0_75] : memref<8x16xf32, #tpu.memory_space<vmem>>, vector<8x16xf32>
      %c0_i32_76 = arith.constant 0 : i32
      %c8_i32 = arith.constant 8 : i32
      %125 = arith.muli %c0_i32_76, %c8_i32 : i32
      %126 = tpu.assume_multiple %125, 8 : i32
      %127 = arith.index_cast %126 : i32 to index
      %c0_77 = arith.constant 0 : index
      %128 = vector.load %arg10[%127, %c0_77] : memref<8x16xf32, #tpu.memory_space<vmem>>, vector<8x16xf32>
      %cst_78 = arith.constant dense<0.000000e+00> : vector<8x8xf32>
      %129 = tpu.matmul %128, %123, %cst_78 {dimension_numbers = #tpu.dot_dimension_numbers<[1], [1], [0], [0], [0, 0, 1, 0], [], []>} : vector<8x16xf32>, vector<8x16xf32>, vector<8x8xf32> -> vector<8x8xf32>
      %cst_79 = arith.constant dense<0xFF800000> : vector<8xf32>
      %130 = vector.multi_reduction <maximumf>, %129, %cst_79 [1] : vector<8x8xf32> to vector<8xf32>
      %131 = vector.shape_cast %130 : vector<8xf32> to vector<8x1xf32>
      %132 = vector.broadcast %131 : vector<8x1xf32> to vector<8x8xf32>
      %133 = arith.subf %129, %132 : vector<8x8xf32>
      %134 = math.exp %133 : vector<8x8xf32>
      %cst_80 = arith.constant dense<0.000000e+00> : vector<8xf32>
      %135 = vector.multi_reduction <add>, %134, %cst_80 [1] : vector<8x8xf32> to vector<8xf32>
      %136 = vector.shape_cast %135 : vector<8xf32> to vector<8x1xf32>
      %137 = tpu.reciprocal %136 {approx = true} : vector<8x1xf32> -> vector<8x1xf32>
      %138 = vector.broadcast %137 : vector<8x1xf32> to vector<8x8xf32>
      %139 = arith.mulf %134, %138 : vector<8x8xf32>
      %cst_81 = arith.constant dense<0.000000e+00> : vector<8x16xf32>
      %140 = tpu.matmul %139, %124, %cst_81 {dimension_numbers = #tpu.dot_dimension_numbers<[1], [0], [0], [1], [0, 0, 1, 1], [], []>} : vector<8x8xf32>, vector<8x16xf32>, vector<8x16xf32> -> vector<8x16xf32>
      %141 = arith.index_cast %126 : i32 to index
      %c0_82 = arith.constant 0 : index
      %142 = vector.load %arg13[%141, %c0_82] : memref<8x32xf32, #tpu.memory_space<vmem>>, vector<8x32xf32>
      %cst_83 = arith.constant dense<0.000000e+00> : vector<8x32xf32>
      %143 = tpu.matmul %140, %82, %cst_83 {dimension_numbers = #tpu.dot_dimension_numbers<[1], [0], [0], [1], [0, 0, 1, 1], [], []>} : vector<8x16xf32>, vector<16x32xf32>, vector<8x32xf32> -> vector<8x32xf32>
      %144 = arith.addf %142, %143 : vector<8x32xf32>
      %145 = arith.index_cast %126 : i32 to index
      %c0_84 = arith.constant 0 : index
      %146 = vector.load %arg13[%145, %c0_84] : memref<8x32xf32, #tpu.memory_space<vmem>>, vector<8x32xf32>
      tpu.vector_store %arg13[%145, %c0_84], %144 {strides = array<i32>} : memref<8x32xf32, #tpu.memory_space<vmem>>, vector<8x32xf32>,
      %c1_i32_85 = arith.constant 1 : i32
    }
    %c2_i32_33 = arith.constant 2 : i32
    %c0_34 = arith.constant 0 : index
    %c0_35 = arith.constant 0 : index
    %61 = vector.load %arg13[%c0_34, %c0_35] : memref<8x32xf32, #tpu.memory_space<vmem>>, vector<8x32xf32>
    %c0_36 = arith.constant 0 : index
    %c0_37 = arith.constant 0 : index
    %62 = vector.load %arg4[%c0_36, %c0_37] : memref<1x32xf32, #tpu.memory_space<vmem>>, vector<1x32xf32>
    %63 = vector.broadcast %62 : vector<1x32xf32> to vector<8x32xf32>
    %64 = arith.addf %61, %63 : vector<8x32xf32>
    %c0_38 = arith.constant 0 : index
    %c0_39 = arith.constant 0 : index
    %65 = vector.load %arg8[%c0_38, %c0_39] : memref<1x32xf32, #tpu.memory_space<vmem>>, vector<1x32xf32>
    %66 = vector.broadcast %65 : vector<1x32xf32> to vector<8x32xf32>
    %67 = arith.addf %64, %66 : vector<8x32xf32>
    %c0_40 = arith.constant 0 : index
    %c0_41 = arith.constant 0 : index
    %c0_42 = arith.constant 0 : index
    %68 = vector.load %arg9[%c0_40, %c0_41, %c0_42] : memref<1x8x32xf32, #tpu.memory_space<vmem>>, vector<1x8x32xf32>
    %69 = vector.shape_cast %68 : vector<1x8x32xf32> to vector<8x32xf32>
    %70 = vector.shape_cast %67 : vector<8x32xf32> to vector<1x8x32xf32>
    tpu.vector_store %arg9[%c0_40, %c0_41, %c0_42], %70 {strides = array<i32>} : memref<1x8x32xf32, #tpu.memory_space<vmem>>, vector<1x8x32xf32>,
    return
  }
  func.func @transform_0(%arg0: i32) -> (i32, i32, i32) {
    %c0_i32 = arith.constant 0 : i32
    %c0_i32_0 = arith.constant 0 : i32
    %c0_i32_1 = arith.constant 0 : i32
    return %arg0, %c0_i32, %c0_i32_0 : i32, i32, i32
  }
  func.func @transform_1(%arg0: i32) -> (i32, i32, i32, i32) {
    %c0_i32 = arith.constant 0 : i32
    %c0_i32_0 = arith.constant 0 : i32
    %c0_i32_1 = arith.constant 0 : i32
    %c0_i32_2 = arith.constant 0 : i32
    %c0_i32_3 = arith.constant 0 : i32
    return %c0_i32, %c0_i32_0, %c0_i32_1, %c0_i32_2 : i32, i32, i32, i32
  }
  func.func @transform_2(%arg0: i32) -> (i32, i32, i32) {
    %c0_i32 = arith.constant 0 : i32
    %c0_i32_0 = arith.constant 0 : i32
    %c0_i32_1 = arith.constant 0 : i32
    %c0_i32_2 = arith.constant 0 : i32
    return %c0_i32, %c0_i32_0, %c0_i32_1 : i32, i32, i32
  }
  func.func @transform_3(%arg0: i32) -> (i32, i32) {
    %c0_i32 = arith.constant 0 : i32
    %c0_i32_0 = arith.constant 0 : i32
    %c0_i32_1 = arith.constant 0 : i32
    return %c0_i32, %c0_i32_0 : i32, i32
  }
  func.func @transform_4(%arg0: i32) -> (i32, i32, i32) {
    %c0_i32 = arith.constant 0 : i32
    %c0_i32_0 = arith.constant 0 : i32
    %c0_i32_1 = arith.constant 0 : i32
    %c0_i32_2 = arith.constant 0 : i32
    return %c0_i32, %c0_i32_0, %c0_i32_1 : i32, i32, i32
  }
  func.func @transform_5(%arg0: i32) -> (i32, i32, i32) {
    %c0_i32 = arith.constant 0 : i32
    %c0_i32_0 = arith.constant 0 : i32
    %c0_i32_1 = arith.constant 0 : i32
    %c0_i32_2 = arith.constant 0 : i32
    return %c0_i32, %c0_i32_0, %c0_i32_1 : i32, i32, i32
  }
  func.func @transform_6(%arg0: i32) -> (i32, i32, i32) {
    %c0_i32 = arith.constant 0 : i32
    %c0_i32_0 = arith.constant 0 : i32
    %c0_i32_1 = arith.constant 0 : i32
    %c0_i32_2 = arith.constant 0 : i32
    return %c0_i32, %c0_i32_0, %c0_i32_1 : i32, i32, i32
  }
  func.func @transform_7(%arg0: i32) -> (i32, i32) {
    %c0_i32 = arith.constant 0 : i32
    %c0_i32_0 = arith.constant 0 : i32
    %c0_i32_1 = arith.constant 0 : i32
    return %c0_i32, %c0_i32_0 : i32, i32
  }
  func.func @transform_8(%arg0: i32) -> (i32, i32, i32) {
    %c0_i32 = arith.constant 0 : i32
    %c0_i32_0 = arith.constant 0 : i32
    %c0_i32_1 = arith.constant 0 : i32
    return %arg0, %c0_i32, %c0_i32_0 : i32, i32, i32
  }
}

</mosaic_0001>

<bundles_post_ra>
// kernel: tpu_custom_call.1
= control target key start
LH: loop header
LB: loop body
LE: loop exit
PB: predicated region body
PF: predicated region fallthrough
CT: control target
= control target key end

     0   :  { %13 = vsyncpa [#allocation7], 0  ;;  %s1678_s0 = inlined_call_operand.vmem [shape: f32[2,8,32], index: 0, kind: input, shape index: {}]   ;;  %s1679_s1 = inlined_call_operand.vmem [shape: f32[3,2,32,16], index: 1, kind: input, shape index: {}]   ;;  %s1680_s2 = inlined_call_operand.vmem [shape: f32[2,16,32], index: 2, kind: input, shape index: {}]   ;;  %s1681_s3 = inlined_call_operand.vmem [shape: f32[1,32], index: 3, kind: input, shape index: {}]   ;;  %s1682_s4 = inlined_call_operand.vmem [shape: f32[1,32,64], index: 4, kind: input, shape index: {}]   ;;  %s1683_s5 = inlined_call_operand.vmem [shape: f32[1,1,64], index: 5, kind: input, shape index: {}]   ;;  %s1684_s6 = inlined_call_operand.vmem [shape: f32[1,64,32], index: 6, kind: input, shape index: {}]   ;;  %s1685_s7 = inlined_call_operand.vmem [shape: f32[1,32], index: 7, kind: input, shape index: {}]   ;;  %s1686_s8 = inlined_call_operand.hbm [shape: f32[2,8,32], index: 8, kind: output, shape index: {}]  }
   0x1   :  { %15 = vsyncpa [#allocation7 + $0x1], 0  ;;  %s1450_s27 = smov 0   ;;  %s1452_s28 = smov 0  }
   0x2   :  { %s1454_s29 = smov 0   ;;  %s1456_s30 = smov 0  }
   0x3 LB: > { %s1471_s9 = sadd.s32 4294967295, %s1393_s30   ;;  %s1115_s10 = sadd.s32 4294967294, %s1393_s30   ;;  %s1393_s30 = sphi %s1456_s30, %s1692_s30   ;;  %s1389_s29 = sphi %s1454_s29, %s1691_s29   ;;  %s1385_s28 = sphi %s1452_s28, %s1690_s28   ;;  %s1381_s27 = sphi %s1450_s27, %s1689_s27  }
   0x4   : > { %s1475_s11 = sadd.s32 1, %s1393_s30   ;;  %s201_s12 = sadd.s32 1, %s1389_s29 }
   0x5   : > { %s198_s13 = ssub.s32 %s1393_s30, %s1475_s11  ;;  %p211_p0 = scmp.ne.s32.totalorder %s1389_s29, %s1385_s28 }
   0x6   : > { %p199_p1 = scmp.eq.s32.totalorder %s198_s13, 0  ;;  %p212_p2 = scmp.eq.s32.totalorder %s1471_s9, 1 }
   0x7   : > { %p217_p3 = scmp.ne.s32.totalorder %s1385_s28, %s1381_s27  ;;  %p218_p4 = scmp.eq.s32.totalorder %s1115_s10, 1 }
   0x8   : > { %s1486_s14 = scalar_select %p199_p1, %s1389_s29, %s201_s12  }
   0x9   : > { %p1488_p5 = por %p212_p2, %p211_p0  ;;  %p1492_p6 = por %p218_p4, %p217_p3 }
   0xa   : > { %p1118_p7 = scmp.ge.s32.totalorder %s1393_s30, 1  ;;  %p264_p8 = scmp.lt.s32.totalorder %s1393_s30, 3 }
   0xc   : > { %p265_p9 = pnand %p1118_p7, %p264_p8 }
   0xd   : > { %s294_s17 = sand.u32 (!%p265_p9), 1, %s1385_s28   ;;  %p297_p10 = scmp.lt.s32.totalorder (!%p265_p9), %s1471_s9, 1 }
   0xe   : > { %268 = sbr.rel (%p265_p9) target bundleno = 1908 (0x774), region = 52  ;;  %s1504_s20 = sshll.u32 (!%p265_p9), %s294_s17, 3 }
   0xf   : > { %s1554_s13 = smov (!%p265_p9), 0  }
  0x13   : > { %v307_v0 = vld [vmem:[%s1682_s4 + $0x18] sm:$0xff]  ;;  %v1399_v1 = vmov 0.0   ;;  %v306_v2 = vld [vmem:[%s1682_s4 + $0x10] sm:$0xff]  ;;  %vm1400_vm0 = vmmov 0   ;;  %vm302_vm1 = vcmask 261120   ;;  %v305_v3 = vld [vmem:[%s1682_s4 + $0x8] sm:$0xff] }
  0x14   : > { %1185 = vmatprep.subr.mxu0 %v1399_v1  ;;  %1193 = vmatprep.mubr.msk.f32.mxu0 %vm1400_vm0, %v1399_v1  ;;  %303 = vst.msk [vmem:[#allocation5] sm:$0xff] %vm302_vm1, %v1399_v1  ;;  %s298_s25 = scalar_select %p297_p10, %s1471_s9, 1  ;;  %v304_v4 = vld [vmem:[%s1682_s4] sm:$0xff]  ;;  %v422_v6 = vld [vmem:[%s1684_s6 + $0x38] sm:$0xff]  ;;  %v421_v7 = vld [vmem:[%s1684_s6 + $0x30] sm:$0xff]  ;;  %v1401_v38 = vmov -1.0  }
  0x15   : > { %1186 = vmatpush3.msra.mxu0 %v307_v0  ;;  %1196 = vmatprep.subr.mxu1 %v1399_v1  ;;  %v420_v8 = vld [vmem:[%s1684_s6 + $0x28] sm:$0xff]  ;;  %v419_v9 = vld [vmem:[%s1684_s6 + $0x20] sm:$0xff]  ;;  %v418_v10 = vld [vmem:[%s1684_s6 + $0x18] sm:$0xff]  ;;  %vm423_vm3 = vcmask 523264  }
  0x16   : > { %1187 = vmatprep.subr.mxu0 %v1399_v1  ;;  %1212 = vmatprep.mubr.msk.f32.mxu1 %vm1400_vm0, %v1399_v1  ;;  %s1120_s12 = sshll.u32 %s298_s25, 3  ;;  %v417_v11 = vld [vmem:[%s1684_s6 + $0x10] sm:$0xff]  ;;  %v416_v12 = vld [vmem:[%s1684_s6 + $0x8] sm:$0xff]  ;;  %v415_v13 = vld [vmem:[%s1684_s6] sm:$0xff] }
  0x17   : > { %1188 = vmatpush3.msra.mxu0 %v306_v2  ;;  %s300_s19 = scalar_lea.vmem %s1678_s0, %s1120_s12  ;;  %1197 = vmatpush3.msra.mxu1 %v422_v6  ;;  %v1121_v14 = vld [vmem:[%s1683_s5] ss:$0 sm:$0xff]  ;;  %s296_s12 = scalar_lea.vmem [#allocation6], %s1504_s20 }
  0x18   : > { %1189 = vmatprep.subr.mxu0 %v1399_v1  ;;  %v1521_v5 = vld [vmem:[%s300_s19] sm:$0xff]  ;;  %1198 = vmatprep.subr.mxu1 %v1399_v1 }
  0x19   : > { %1190 = vmatpush3.msra.mxu0 %v305_v3  ;;  %1199 = vmatpush3.msra.mxu1 %v421_v7 }
  0x1a   : > { %1191 = vmatprep.subr.mxu0 %v1399_v1  ;;  %1200 = vmatprep.subr.mxu1 %v1399_v1 }
  0x1b   : > { %1192 = vmatpush3.msra.mxu0 %v304_v4  ;;  %1201 = vmatpush3.msra.mxu1 %v420_v8  ;;  %v414_v44 = vld [vmem:[#allocation5] sm:$0xff] }
  0x1c   : > { %1194 = vmatmul.mubr.msk.f32.vlgmr.msra.gmra.mxu0 %vm302_vm1, %v1521_v5  ;;  %1202 = vmatprep.subr.mxu1 %v1399_v1 }
  0x1d   : > { %1203 = vmatpush3.msra.mxu1 %v419_v9 }
  0x1e   : > { %1204 = vmatprep.subr.mxu1 %v1399_v1 }
  0x1f   : > { %1205 = vmatpush3.msra.mxu1 %v418_v10 }
  0x20   : > { %1206 = vmatprep.subr.mxu1 %v1399_v1 }
  0x21   : > { %1207 = vmatpush3.msra.mxu1 %v417_v11 }
  0x22   : > { %1208 = vmatprep.subr.mxu1 %v1399_v1 }
  0x23   : > { %1209 = vmatpush3.msra.mxu1 %v416_v12 }
  0x24   : > { %1210 = vmatprep.subr.mxu1 %v1399_v1 }
  0x25   : > { %1211 = vmatpush3.msra.mxu1 %v415_v13 }
  0xdc   : > { %v384_v15 = vpop.f32.mrf.mxu0 }
  0xdd   : > { %v385_v16 = vadd.f32 %v1121_v14, %v384_v15 }
  0xde   : > { %v1195_v17 = vpop.f32.mrf.mxu0 }
  0xdf   : > { %v389_v18 = vmul.f32 0.70710677, %v385_v16  ;;  %v388_v41 = vmul.f32 0.5, %v385_v16 }
  0xe1   : > { %v392_v19 = vand.u32 2147483647, %v389_v18  ;;  %vm390_vm2 = vcmp.ge.f32.partialorder %v389_v18, 0.0 }
  0xe2   : > { %v391_v39 = vsel %vm390_vm2, 1.0, %v1401_v38 }
  0xe3   : > { %v393_v20 = vmul.f32 0.3275911, %v392_v19  ;;  %v405_v22 = vsub.f32 0.0, %v392_v19 }
  0xe5   : > { %v394_v21 = vadd.f32 1.0, %v393_v20  ;;  %v406_v23 = vmul.f32 %v405_v22, %v392_v19 }
  0xe7   : > { %1317 = vrcp.f32 %v394_v21  ;;  %v407_v26 = vmul.f32 1.442695, %v406_v23 }
  0xe9   : > { %1319 = vpow2.f32 %v407_v26 }
  0xf4   : > { %v1318_v24 = vpop.eup %1317 }
  0xf5   : > { %v396_v25 = vmul.f32 1.0614054, %v1318_v24 }
  0xf6   : > { %v1320_v35 = vpop.eup %1319 }
  0xf7   : > { %v397_v27 = vadd.f32 -1.4531521, %v396_v25 }
  0xf9   : > { %v398_v28 = vmul.f32 %v1318_v24, %v397_v27 }
  0xfb   : > { %v399_v29 = vadd.f32 1.4214138, %v398_v28 }
  0xfd   : > { %v400_v30 = vmul.f32 %v1318_v24, %v399_v29 }
  0xff   : > { %v401_v31 = vadd.f32 -0.28449672, %v400_v30 }
 0x101   : > { %v402_v32 = vmul.f32 %v1318_v24, %v401_v31 }
 0x103   : > { %v403_v33 = vadd.f32 0.2548296, %v402_v32 }
 0x105   : > { %v404_v34 = vmul.f32 %v1318_v24, %v403_v33 }
 0x107   : > { %v409_v36 = vmul.f32 %v1320_v35, %v404_v34 }
 0x109   : > { %v410_v37 = vsub.f32 1.0, %v409_v36 }
 0x10b   : > { %v411_v40 = vmul.f32 %v410_v37, %v391_v39 }
 0x10d   : > { %v412_v42 = vadd.f32 1.0, %v411_v40 }
 0x10f   : > { %v413_v43 = vmul.f32 %v412_v42, %v388_v41 }
 0x111   : > { %1213 = vmatmul.mubr.msk.f32.vlgmr.msra.gmra.mxu1 %vm423_vm3, %v413_v43 }
 0x1d1   : > { %v493_v45 = vpop.f32.mrf.mxu1 }
 0x1d2   : > { %v497_v46 = vadd.f32 %v493_v45, %v414_v44 }
 0x1d3   : > { %v1214_v47 = vpop.f32.mrf.mxu1 }
 0x1d4   : > { %498 = vst.msk [vmem:[#allocation5] sm:$0xff] %vm302_vm1, %v497_v46 }
 0x1d5 LB: >> { %v1402_v48 = vmov 0.0   ;;  %s1124_s18 = sshll.u32 %s1397_s13, 5  ;;  %vm1403_vm4 = vmmov 0   ;;  %vm597_vm5 = vcmask 130048   ;;  %vm848_vm6 = vcmask 64512   ;;  %s1135_s23 = sshll.u32 %s1397_s13, 4  ;;  %s1397_s13 = sphi %s1554_s13, %s504_s13  }
 0x1d6   : >> { %1226 = vmatprep.subr.mxu1 %v1402_v48  ;;  %1215 = vmatprep.subr.mxu0 %v1402_v48  ;;  %s1569_s22 = scalar_lea.vmem %s1679_s1, %s1124_s18  ;;  %s524_s26 = scalar_lea.vmem %s1680_s2, %s1135_s23 }
 0x1d7   : >> { %1234 = vmatprep.mubr.msk.f32.mxu1 %vm1403_vm4, %v1402_v48  ;;  %1223 = vmatprep.mubr.msk.f32.mxu0 %vm1403_vm4, %v1402_v48  ;;  %v1129_v49 = vld [vmem:[%s1569_s22 + $0x58] sm:$0xff]  ;;  %v1128_v51 = vld [vmem:[%s1569_s22 + $0x50] sm:$0xff]  ;;  %v1127_v53 = vld [vmem:[%s1569_s22 + $0x48] sm:$0xff]  ;;  %s504_s13 = sadd.s32 1, %s1397_s13  }
 0x1d8   : >> { %v510_v50 = vld [vmem:[%s1569_s22 + $0x18] sm:$0xff]  ;;  %1227 = vmatpush3.msra.mxu1 %v1129_v49  ;;  %v509_v52 = vld [vmem:[%s1569_s22 + $0x10] sm:$0xff]  ;;  %v508_v54 = vld [vmem:[%s1569_s22 + $0x8] sm:$0xff]  ;;  %p501_p11 = scmp.ge.s32.totalorder %s504_s13, 2  }
 0x1d9   : >> { %1216 = vmatpush3.msra.mxu0 %v510_v50  ;;  %1228 = vmatprep.subr.mxu1 %v1402_v48  ;;  %v1126_v55 = vld [vmem:[%s1569_s22 + $0x40] sm:$0xff]  ;;  %v1134_v23 = vld [vmem:[%s1569_s22 + $0x98] sm:$0xff]  ;;  %v1133_v24 = vld [vmem:[%s1569_s22 + $0x90] sm:$0xff]  ;;  %s1041_s23 = sshll.u32 (%p501_p11), %s296_s12, 4  ;;  %s1404_s18 = smov (%p501_p11), [#allocation6]   ;;  %s1042_s23 = int_to_ptr.vmem [resolvable:$true] %s1041_s23 }
 0x1da   : >> { %1217 = vmatprep.subr.mxu0 %v1402_v48  ;;  %1229 = vmatpush3.msra.mxu1 %v1128_v51  ;;  %v507_v56 = vld [vmem:[%s1569_s22] sm:$0xff]  ;;  %v1132_v25 = vld [vmem:[%s1569_s22 + $0x88] sm:$0xff]  ;;  %s1329_s10 = scalar_lea.vmem (%p501_p11), %s1042_s23, 128 }
 0x1db   : >> { %1218 = vmatpush3.msra.mxu0 %v509_v52  ;;  %1230 = vmatprep.subr.mxu1 %v1402_v48  ;;  %v1131_v26 = vld [vmem:[%s1569_s22 + $0x80] sm:$0xff]  ;;  %v526_v38 = vld [vmem:[%s524_s26 + $0x8] sm:$0xff]  ;;  %v933_v45 = vld [vmem:[#allocation5] sm:$0xff]  ;;  %s1146_s22 = sshll.u32 (%p501_p11), %s1471_s9, 7  ;;  %p1330_p12 = scmp.ne.s32.totalorder (%p501_p11), %s1042_s23, %s1329_s10 }
 0x1dc   : >> { %1219 = vmatprep.subr.mxu0 %v1402_v48  ;;  %1231 = vmatpush3.msra.mxu1 %v1127_v53  ;;  %v525_v39 = vld [vmem:[%s524_s26] sm:$0xff]  ;;  %s1039_s25 = scalar_lea.hbm (%p501_p11), %s1686_s8, %s1146_s22  ;;  %s1028_s26 = scalar_lea.sflag (%p501_p11), [#allocation7], %s294_s17 }
 0x1dd   : >> { %1220 = vmatpush3.msra.mxu0 %v508_v54  ;;  %1232 = vmatprep.subr.mxu1 %v1402_v48  ;;  %v1143_v50 = vld [vmem:[%s1681_s3] ss:$0 sm:$0xff] (%p501_p11)  ;;  %p1331_p13 = pnand (%p501_p11), %p1330_p12, %p1488_p5  ;;  %s1333_s9 = sshll.u32 (%p501_p11), %s1404_s18, 4  ;;  %s1334_s9 = int_to_ptr.vmem [resolvable:$false] %s1333_s9 }
 0x1de   : >> { %1221 = vmatprep.subr.mxu0 %v1402_v48  ;;  %1233 = vmatpush3.msra.mxu1 %v1126_v55  ;;  %v1144_v51 = vld [vmem:[%s1685_s7] ss:$0 sm:$0xff] (%p501_p11)  ;;  %s1335_s19 = scalar_lea.vmem (%p501_p11), %s1334_s9, 256  ;;  %p1336_p1 = scmp.lt.s32.totalorder (%p501_p11), %s1042_s23, %s1334_s9 }
 0x1df   : >> { %1222 = vmatpush3.msra.mxu0 %v507_v56  ;;  %1235 = vmatmul.mubr.msk.f32.vlgmr.msra.gmra.mxu1 %vm302_vm1, %v1521_v5  ;;  %p1332_p0 = pneg (%p501_p11), %p1331_p13  ;;  %p1337_p2 = scmp.lt.s32.totalorder (%p501_p11), %s1335_s19, %s1329_s10 }
 0x1e0   : >> { %1224 = vmatmul.mubr.msk.f32.vlgmr.msra.gmra.mxu0 %vm302_vm1, %v1521_v5  ;;  %1248 = vmatprep.subr.mxu1 %v1402_v48 }
 0x1e1   : >> { %1250 = vmatprep.mubr.msk.f32.mxu1 %vm1403_vm4, %v1402_v48  ;;  %1237 = vmatprep.subr.mxu0 %v1402_v48  ;;  %p1338_p3 = por (%p501_p11), %p1337_p2, %p1336_p1 }
 0x1e2   : >> { %1245 = vmatprep.mubr.msk.f32.mxu0 %vm1403_vm4, %v1402_v48  ;;  %1238 = vmatpush3.msra.mxu0 %v1134_v23 }
 0x1e3   : >> { %1239 = vmatprep.subr.mxu0 %v1402_v48  ;;  %p1339_p4 = pnand (%p501_p11), %p1338_p3, %p1332_p0 }
 0x1e4   : >> { %1240 = vmatpush3.msra.mxu0 %v1133_v24 }
 0x1e5   : >> { %1241 = vmatprep.subr.mxu0 %v1402_v48 }
 0x1e6   : >> { %1242 = vmatpush3.msra.mxu0 %v1132_v25 }
 0x1e7   : >> { %1243 = vmatprep.subr.mxu0 %v1402_v48 }
 0x1e8   : >> { %1244 = vmatpush3.msra.mxu0 %v1131_v26 }
 0x1e9   : >> { %1246 = vmatmul.mubr.msk.f32.vlgmr.msra.gmra.mxu0 %vm302_vm1, %v1521_v5  ;;  %1258 = vmatprep.subr.mxu0 %v1402_v48 }
 0x1ea   : >> { %1262 = vmatprep.mubr.msk.f32.mxu0 %vm1403_vm4, %v1402_v48  ;;  %1259 = vmatpush3.msra.mxu0 %v526_v38 }
 0x1eb   : >> { %1260 = vmatprep.subr.mxu0 %v1402_v48 }
 0x1ec   : >> { %1261 = vmatpush3.msra.mxu0 %v525_v39 }
 0x29f   : >> { %v680_v57 = vpop.f32.mrf.mxu1 }
 0x2a0   : >> { %v593_v58 = vpop.f32.mrf.mxu0  ;;  %v684_v59 = vsel %vm597_vm5, %v680_v57, 0.0 }
 0x2a1   : >> { %685 = vadd.xlane.f32.xlu0 %v684_v59  ;;  %v1236_v60 = vpop.f32.mrf.mxu1  ;;  %v598_v62 = vsel %vm597_vm5, %v593_v58, 0.0 }
 0x2a2   : >> { %v1225_v61 = vpop.f32.mrf.mxu0 }
 0x2a5   : >> { %599 = vadd.xlane.f32.xlu0 %v598_v62 }
 0x2a9   : >> { %v764_v35 = vpop.f32.mrf.mxu0 }
 0x2aa   : >> { %768 = vst.msk [vmem:[#allocation4] sm:$0xff] %vm597_vm5, %v764_v35 }
 0x2ab   : >> { %v1247_v36 = vpop.f32.mrf.mxu0 }
 0x2b1   : >> { %v770_v37 = vld [vmem:[#allocation4] sm:$0xff] }
 0x32a   : >> { %v686_v63 = vpop.xlane.xlu0 %685 }
 0x32b   : >> { %v687_v0 = vmul.f32 0.0625, %v686_v63 }
 0x32d   : >> { %v688_v1 = vsub.f32 %v680_v57, %v687_v0 }
 0x32e   : >> { %v600_v2 = vpop.xlane.xlu0 %599 }
 0x32f   : >> { %v602_v3 = vmul.f32 0.0625, %v600_v2  ;;  %v689_v4 = vmul.f32 %v688_v1, %v688_v1 }
 0x331   : >> { %v603_v6 = vsub.f32 %v593_v58, %v602_v3  ;;  %v690_v7 = vsel %vm597_vm5, %v689_v4, 0.0 }
 0x332   : >> { %691 = vadd.xlane.f32.xlu1 %v690_v7 }
 0x333   : >> { %v604_v8 = vmul.f32 %v603_v6, %v603_v6 }
 0x335   : >> { %v605_v9 = vsel %vm597_vm5, %v604_v8, 0.0 }
 0x336   : >> { %606 = vadd.xlane.f32.xlu1 %v605_v9 }
 0x3bb   : >> { %v692_v10 = vpop.xlane.xlu1 %691 }
 0x3bc   : >> { %v693_v11 = vmul.f32 0.0625, %v692_v10 }
 0x3be   : >> { %v694_v12 = vadd.f32 1e-05, %v693_v11 }
 0x3bf   : >> { %v607_v13 = vpop.xlane.xlu1 %606 }
 0x3c0   : >> { %1321 = vrsqrt.f32 %v694_v12  ;;  %v608_v14 = vmul.f32 0.0625, %v607_v13 }
 0x3c2   : >> { %v609_v15 = vadd.f32 1e-05, %v608_v14 }
 0x3c4   : >> { %1323 = vrsqrt.f32 %v609_v15 }
 0x3cd   : >> { %v1322_v16 = vpop.eup %1321 }
 0x3ce   : >> { %v696_v17 = vmul.f32 %v1322_v16, %v688_v1 }
 0x3d0   : >> { %697 = vst.msk [vmem:[#allocation3] sm:$0xff] %vm597_vm5, %v696_v17 }
 0x3d1   : >> { %v1324_v18 = vpop.eup %1323 }
 0x3d2   : >> { %v611_v19 = vmul.f32 %v1324_v18, %v603_v6 }
 0x3d4   : >> { %v612_v20 = vmul.f32 0.17677669, %v611_v19 }
 0x3d6   : >> { %613 = vst.msk [vmem:[#allocation2] sm:$0xff] %vm597_vm5, %v612_v20 }
 0x3d7   : >> { %v769_v21 = vld [vmem:[#allocation3] sm:$0xff] }
 0x3d8   : >> { %1249 = vmatpush3.xpose.msk.msra.mxu1 %vm597_vm5, %v769_v21 }
 0x3d9   : >> { %1253 = vmatprep.subr.mxu1 %v1402_v48 }
 0x3dd   : >> { %v771_v22 = vld [vmem:[#allocation2] sm:$0xff] }
 0x3de   : >> { %1251 = vmatmul.mubr.msk.f32.vlgmr.msra.gmra.mxu1 %vm597_vm5, %v771_v22 }
 0x3df   : >> { %1255 = vmatprep.mubr.msk.f32.mxu1 %vm1403_vm4, %v1402_v48  ;;  %1254 = vmatpush3.msra.mxu1 %v770_v37 }
 0x49e   : >> { %v844_v27 = vpop.f32.mrf.mxu1 }
 0x49f   : >> { %v849_v28 = vsel %vm848_vm6, %v844_v27, -inf }
 0x4a0   : >> { %850 = vmax.xlane.f32.xlu0 %v849_v28  ;;  %v1252_v29 = vpop.f32.mrf.mxu1 }
 0x529   : >> { %v851_v30 = vpop.xlane.xlu0 %850 }
 0x52a   : >> { %v852_v31 = vsub.f32 %v844_v27, %v851_v30 }
 0x52c   : >> { %v853_v32 = vmul.f32 1.442695, %v852_v31 }
 0x52e   : >> { %1325 = vpow2.f32 %v853_v32 }
 0x53b   : >> { %v1326_v33 = vpop.eup %1325 }
 0x53c   : >> { %v855_v34 = vsel %vm848_vm6, %v1326_v33, 0.0 }
 0x53d   : >> { %856 = vadd.xlane.f32.xlu1 %v855_v34 }
 0x5c6   : >> { %v857_v40 = vpop.xlane.xlu1 %856 }
 0x5c7   : >> { %1327 = vrcp.f32 %v857_v40 }
 0x5d4   : >> { %v1328_v41 = vpop.eup %1327 }
 0x5d5   : >> { %v859_v42 = vmul.f32 %v1328_v41, %v1326_v33 }
 0x5d7   : >> { %1256 = vmatmul.mubr.msk.f32.vlgmr.msra.gmra.mxu1 %vm848_vm6, %v859_v42 }
 0x697   : >> { %v929_v43 = vpop.f32.mrf.mxu1 }
 0x698   : >> { %1263 = vmatmul.mubr.msk.f32.vlgmr.msra.gmra.mxu0 %vm597_vm5, %v929_v43 }
 0x699   : >> { %v1257_v44 = vpop.f32.mrf.mxu1 }
 0x757   : > { %503 = sbr.rel (!%p501_p11) target bundleno = 469 (0x1d5), region = 98 }
 0x758   : >> { %v1003_v46 = vpop.f32.mrf.mxu0 }
 0x759   : >> { %v1007_v47 = vadd.f32 %v1003_v46, %v933_v45 }
 0x75a   : >> { %v1264_v49 = vpop.f32.mrf.mxu0 }
 0x75b   : >> { %1008 = vst.msk [vmem:[#allocation5] sm:$0xff] %vm302_vm1, %v1007_v47 }
 0x762   : > { %v1009_v48 = vld [vmem:[#allocation5] sm:$0xff] }
 0x763   : > { %v1017_v52 = vadd.f32 %v1143_v50, %v1009_v48 }
 0x765   : > { %v1025_v53 = vadd.f32 %v1144_v51, %v1017_v52 }
 0x767   : > { %1026 = vst.msk [vmem:[%s296_s12] sm:$0xff] %vm302_vm1, %v1025_v53 }
 0x768   : > { %1342 = shalt.err (!%p1339_p4)
}
 0x769   : > { %s1343_s21 = scalar_lea.hbm %s1039_s25, 128  ;;  %s1347_s12 = scalar_lea.hbm %s1686_s8, 256 }
 0x76a   : > { %p1344_p7 = scmp.ne.s32.totalorder %s1039_s25, %s1343_s21  ;;  %p1348_p10 = scmp.lt.s32.totalorder %s1039_s25, %s1686_s8 }
 0x76b   : > { %p1349_p11 = scmp.lt.s32.totalorder %s1347_s12, %s1343_s21 }
 0x76c   : > { %p1345_p8 = pnand %p1344_p7, %p1488_p5 }
 0x76d   : > { %p1350_p12 = por %p1349_p11, %p1348_p10 }
 0x76e   : > { %p1346_p9 = pneg %p1345_p8 }
 0x770   : > { %p1351_p13 = pnand %p1350_p12, %p1346_p9 }
 0x772   : > { %1354 = shalt.err (!%p1351_p13)
}
 0x773   : > { %1265 = dma.vmem_to_hbm [thread:$0]  (%p1488_p5), %s1042_s23, 128, %s1039_s25, %s1028_s26  }
 0x774 PF: > { %p1271_p0 = scmp.ge.s32.totalorder %s1393_s30, 2  ;;  %s1053_s24 = sand.u32 1, %s1381_s27  }
 0x775   : > { %s1054_s10 = scalar_lea.sflag [#allocation7], %s1053_s24 }
 0x776   : > { %p1268_p1 = pnand %p1271_p0, %p1492_p6 }
 0x778   : > { %p1269_p2 = pneg %p1268_p1 }
 0x77a   : > { %1376 = dma.done.wait (%p1269_p2), %s1054_s10, 128  }
 0x77b   : > { %1378 = vsyncadd (%p1269_p2), %s1054_s10, 4294967168  ;;  %p18_p3 = scmp.ge.s32.totalorder %s1475_s11, 4   ;;  %s1689_s27 = smov %s1385_s28 }
 0x77c   : > { %s1690_s28 = smov %s1389_s29  ;;  %s1691_s29 = smov %s1486_s14 }
 0x77d   : > { %s1692_s30 = smov %s1475_s11  ;;  %20 = sbr.rel (!%p18_p3) target bundleno = 3 (0x3), region = 109 }
 0x782   :  { %1059 = vsyncpa [#allocation7], 1 }
 0x783   :  { %1061 = vsyncpa [#allocation7 + $0x1], 1 }

</bundles_post_ra>
